<compile_context>
chip_gen: v7x
topology: tpu7x:2x2x1
jax: 0.10.0
libtpu: 0.0.40
codegen_flags: <defaults>
</compile_context>

<pallas_src>
import functools

import numpy as np
import jax
import jax.numpy as jnp
from jax.experimental import pallas as pl
from jax.experimental.pallas import tpu as pltpu


def _round_up(x, m):
    return (x + m - 1) // m * m


def _pick_td(d):
    # Largest tile of the feature dim that divides D (fewer grid steps, each
    # step's centroid DMA is L_pad*TD*4 bytes >= ~1.5 MB for realistic L).
    for td in (1024, 512, 256, 128):
        if d % td == 0:
            return td
    return d  # D not a multiple of 128: single full-width block (still legal).


# ---------------------------------------------------------------------------
# Pallas kernel: logits = feats @ centroids^T * scale, streamed over D.
#   step k:   acc[b, l] += feat_blk[b, :] . cent_blk[l, :]      (f32 MXU)
#   epilogue: mask padded classes, log-softmax over classes, pick target logit,
#             write per-example CE loss (B, 1).
# ---------------------------------------------------------------------------
def cam_ce_kernel(feat_ref, cent_ref, scale_ref, tgt_ref, loss_ref, acc_ref,
                  *, num_classes):
    k = pl.program_id(0)

    @pl.when(k == 0)
    def _():
        acc_ref[...] = jnp.zeros_like(acc_ref)

    # (B, TD) x (Lp, TD)^T -> (B, Lp), f32 accumulate on the MXU.
    acc_ref[...] += jax.lax.dot_general(
        feat_ref[...], cent_ref[...], (((1,), (1,)), ((), ())),
        preferred_element_type=jnp.float32)

    @pl.when(k == pl.num_programs(0) - 1)
    def _():
        B, Lp = acc_ref.shape
        logits = acc_ref[...] * scale_ref[...]                     # (B, Lp)
        class_ids = jax.lax.broadcasted_iota(jnp.int32, (B, Lp), 1)
        # Padded class columns (>= num_classes) must not enter the softmax.
        masked = jnp.where(class_ids < num_classes, logits, jnp.float32(-1e30))
        row_max = jnp.max(masked, axis=1, keepdims=True)           # (B, 1)
        shifted = masked - row_max
        lse = jnp.log(jnp.sum(jnp.exp(shifted), axis=1, keepdims=True)) + row_max
        # loss_b = lse_b - logits[b, target_b]; target selected via iota compare
        # against the (B, 1) int32 target column (no dense one-hot from HBM).
        tgt_logit = jnp.sum(
            jnp.where(class_ids == tgt_ref[...], logits, 0.0),
            axis=1, keepdims=True)                                 # (B, 1)
        loss_ref[...] = lse - tgt_logit                            # (B, 1)


def cam_memory_ce_per_example(features_f32, centroids_pad, scale_row,
                              targets_col, num_classes):
    B, D = features_f32.shape
    Lp = centroids_pad.shape[0]
    TD = _pick_td(D)
    n_blocks = D // TD

    grid_spec = pltpu.PrefetchScalarGridSpec(
        num_scalar_prefetch=0,
        grid=(n_blocks,),
        in_specs=[
            pl.BlockSpec((B, TD), lambda k: (0, k)),    # batch feats (streamed over D)
            pl.BlockSpec((Lp, TD), lambda k: (0, k)),   # class-sum centroids (streamed)
            pl.BlockSpec((1, Lp), lambda k: (0, 0)),    # 1/(temp*count) per class
            pl.BlockSpec((B, 1), lambda k: (0, 0)),     # target class index per example
        ],
        out_specs=pl.BlockSpec((B, 1), lambda k: (0, 0)),
        scratch_shapes=[pltpu.VMEM((B, Lp), jnp.float32)],
    )
    cost = pl.CostEstimate(
        flops=2 * B * D * Lp + 8 * B * Lp,
        transcendentals=B * Lp + B,
        bytes_accessed=(B * D + Lp * D + Lp + 2 * B) * 4,
    )
    kernel = functools.partial(cam_ce_kernel, num_classes=num_classes)
    # Tiles are at most a few MB; default scoped VMEM (16/32 MiB) is ample on
    # v5e/v6e/v7x, so no vmem_limit override is needed.
    return pl.pallas_call(
        kernel,
        out_shape=jax.ShapeDtypeStruct((B, 1), jnp.float32),
        grid_spec=grid_spec,
        compiler_params=pltpu.CompilerParams(
            dimension_semantics=("arbitrary",)),
        cost_estimate=cost,
    )(features_f32, centroids_pad, scale_row, targets_col)


# ---------------------------------------------------------------------------
# Plain-JAX glue reproducing CamMemory semantics
# ---------------------------------------------------------------------------
def _masked_mean_std(x, mask, cnt):
    # torch .mean(0) / .std(0) (unbiased, /(n-1)) over rows selected by `mask`.
    m = mask.astype(x.dtype)[:, None]
    mean = (x * m).sum(0) / cnt
    var = (((x - mean) ** 2) * m).sum(0) / (cnt - 1)
    return mean, jnp.sqrt(var)


class CamMemoryJAX:
    def __init__(self, num_features, num_samples, num_classes, num_cams,
                 temp=0.05, momentum=0.2, key=None):
        self.num_features = num_features
        self.num_samples = num_samples
        self.momentum = momentum
        self.temp = temp

        # Deterministic synthetic buffer init (module __init__ only gives shapes;
        # zeros would make the loss degenerate, so use normalized random rows).
        key = jax.random.PRNGKey(0) if key is None else key
        feats = jax.random.normal(key, (num_samples, num_features), jnp.float32)
        self.features = feats / jnp.linalg.norm(feats, axis=1, keepdims=True)
        self.labels = jnp.arange(num_samples, dtype=jnp.int32) % num_classes
        self.cam = jnp.arange(num_samples, dtype=jnp.int32) % num_cams
        self.global_std = jnp.zeros((num_features,), jnp.float32)
        self.global_mean = jnp.zeros((num_features,), jnp.float32)

        self.num_classes = int(self.labels.max()) + 1     # labels.max()+1, as in torch
        self.L_pad = _round_up(self.num_classes, 128)     # lane-dense class dim
        self._refresh_class_stats()

    # -- class-sum centroids + per-class scale (kept in sync with `features`) --
    def _refresh_class_stats(self):
        L, Lp = self.num_classes, self.L_pad
        counts = jax.ops.segment_sum(
            jnp.ones((self.num_samples,), jnp.float32), self.labels,
            num_segments=L)
        # NOTE: reference divides by 0 for empty classes (inf/nan); we guard.
        safe_counts = jnp.maximum(counts, 1.0)
        scale = jnp.zeros((Lp,), jnp.float32).at[:L].set(
            1.0 / (self.temp * safe_counts))
        self.scale_row = scale[None, :]                                  # (1, Lp)
        cents = jax.ops.segment_sum(self.features, self.labels, num_segments=L)
        self.centroids_pad = (jnp.zeros((Lp, self.num_features), jnp.float32)
                              .at[:L].set(cents))                        # (Lp, D)

    def updateEM(self, inputs, indexes):
        # Sequential per-row EMA + renorm (matches the torch loop, handles
        # duplicate indexes), with an O(B*D) incremental centroid refresh so the
        # precomputed class sums never go stale.
        feats = self.features
        cents = self.centroids_pad
        labs = np.asarray(self.labels)
        for b, y in enumerate([int(i) for i in np.asarray(indexes)]):
            old = feats[y]
            new = self.momentum * old + (1.0 - self.momentum) * inputs[b]
            new = new / jnp.linalg.norm(new)
            feats = feats.at[y].set(new)
            cents = cents.at[int(labs[y])].add(new - old)
        self.features = feats
        self.centroids_pad = cents

    def _update_params(self):
        cam_vals = sorted(set(np.asarray(self.cam).tolist()))
        stds, means = [], []
        for c in cam_vals:
            mask = self.cam == c
            cnt = int(mask.sum())
            if cnt <= 1:
                continue
            mean, std = _masked_mean_std(self.features, mask, cnt)
            stds.append(std)
            means.append(mean)
        self.global_std = (self.momentum * jnp.stack(stds).mean(0)
                           + (1.0 - self.momentum) * self.global_std)
        self.global_mean = (self.momentum * jnp.stack(means).mean(0)
                            + (1.0 - self.momentum) * self.global_mean)

    def _ce_per_example(self, features, targets):
        tgt_col = targets.astype(jnp.int32)[:, None]                    # (B, 1)
        return cam_memory_ce_per_example(
            features.astype(jnp.float32), self.centroids_pad,
            self.scale_row, tgt_col, self.num_classes)                  # (B, 1)

    def forward(self, features, indexes, cameras, symmetric=False):
        self._update_params()

        targets = self.labels[indexes]                                  # (B,)
        per_ex = self._ce_per_example(features, targets)                # (B, 1)
        loss = jnp.mean(per_ex)

        # Per-camera mean/std regularizer (data-dependent group sizes -> glue).
        # Mirrors the original's `for cur_cam in range(len(cam_set))` indexing.
        cam_set = sorted(set(np.asarray(self.cam).tolist()))
        loss_cam_terms = []
        for cur_cam in range(len(cam_set)):
            mask = cameras == cur_cam
            cnt = int(mask.sum())
            if cnt <= 1:
                continue
            mean, std = _masked_mean_std(features, mask, cnt)
            loss_cam_terms.append(((mean - self.global_mean) ** 2).sum())
            loss_cam_terms.append(((std - self.global_std) ** 2).sum())
        loss_cam = (jnp.float32(0.0) if not loss_cam_terms
                    else jnp.stack(loss_cam_terms).mean())

        # TODO(synk): symmetric=True branch (softmax(sim) * log_softmax(one-hot))
        # not implemented; default path is symmetric=False.
        loss_sym = 0.0
        return loss + loss_sym + loss_cam


# ---------------------------------------------------------------------------
if __name__ == "__main__":
    # D=384 -> TD=128 -> 3 grid steps (exercises the pipelined D stream);
    # N=300 / L=8 (L_pad=128) exercise the padded-class masking.
    B, D, N, L, C = 8, 384, 300, 8, 3

    key = jax.random.PRNGKey(0)
    k_mem, k_x, k_idx, k_upd = jax.random.split(key, 4)

    mem = CamMemoryJAX(num_features=D, num_samples=N, num_classes=L,
                       num_cams=C, temp=0.05, momentum=0.2, key=k_mem)

    x = jax.random.normal(k_x, (B, D), jnp.float32)
    x = x / jnp.linalg.norm(x, axis=1, keepdims=True)
    indexes = jax.random.randint(k_idx, (B,), 0, N, dtype=jnp.int32)
    cameras = jnp.array([0, 0, 0, 1, 1, 1, 2, 2], dtype=jnp.int32)

    # Exercise the EMA memory write + incremental centroid maintenance path.
    upd = jax.random.normal(k_upd, (B, D), jnp.float32)
    upd = upd / jnp.linalg.norm(upd, axis=1, keepdims=True)
    mem.updateEM(upd, indexes)

    # Pure-JAX reference through the full N path (validates the centroid algebra
    # and the kernel's CE epilogue).
    targets = mem.labels[indexes]
    sims = (x @ mem.features.T) / mem.temp                               # (B, N)
    sim_lb = jax.ops.segment_sum(sims.T, mem.labels, num_segments=L)     # (L, B)
    counts = jax.ops.segment_sum(jnp.ones((N,), jnp.float32), mem.labels,
                                 num_segments=L)
    sim_lb = sim_lb / counts[:, None]
    logp = jax.nn.log_softmax(sim_lb.T, axis=1)                          # (B, L)
    ref = -logp[jnp.arange(B), targets]

    got = mem._ce_per_example(x, targets)[:, 0]
    got = jax.block_until_ready(got)
    np.testing.assert_allclose(np.asarray(got), np.asarray(ref),
                               rtol=2e-4, atol=2e-4)

    loss = mem.forward(x, indexes, cameras, symmetric=False)
    loss = jax.block_until_ready(loss)
    assert bool(jnp.isfinite(loss)), "loss is not finite"
    print("KERNEL_OK")
</pallas_src>

<mosaic_0001>
module attributes {stable_mosaic.version = 11 : i64} {
  func.func @cam_ce_kernel(%arg0: i32, %arg1: memref<8x128xf32, #tpu.memory_space<vmem>>, %arg2: memref<128x128xf32, #tpu.memory_space<vmem>>, %arg3: memref<1x128xf32, #tpu.memory_space<vmem>>, %arg4: memref<8x1xi32, #tpu.memory_space<vmem>>, %arg5: memref<8x1xf32, #tpu.memory_space<vmem>>, %arg6: memref<8x128xf32, #tpu.memory_space<vmem>>) attributes {dimension_semantics = [#tpu.dimension_semantics<arbitrary>], iteration_bounds = array<i64: 3>, scalar_prefetch = 0 : i64, scratch_operands = 1 : i64, tpu.core_type = #tpu.core_type<tc>, window_params = [{transform_indices = @transform_0, window_bounds = array<i64: 8, 128>}, {transform_indices = @transform_1, window_bounds = array<i64: 128, 128>}, {pipeline_mode = #tpu.pipeline_mode<synchronous>, transform_indices = @transform_2, window_bounds = array<i64: 1, 128>}, {pipeline_mode = #tpu.pipeline_mode<synchronous>, transform_indices = @transform_3, window_bounds = array<i64: 8, 1>}, {pipeline_mode = #tpu.pipeline_mode<synchronous>, transform_indices = @transform_4, window_bounds = array<i64: 8, 1>}]} {
    %c0_i32 = arith.constant 0 : i32
    %0 = arith.cmpi eq, %arg0, %c0_i32 : i32
    %1 = arith.extui %0 : i1 to i32
    %c0_i32_0 = arith.constant 0 : i32
    %2 = arith.cmpi ne, %1, %c0_i32_0 : i32
    scf.if %2 {
      %cst_9 = arith.constant 0.000000e+00 : f32
      %12 = vector.broadcast %cst_9 : f32 to vector<8x128xf32>
      %c0_10 = arith.constant 0 : index
      %c0_11 = arith.constant 0 : index
      %13 = vector.load %arg6[%c0_10, %c0_11] : memref<8x128xf32, #tpu.memory_space<vmem>>, vector<8x128xf32>
      tpu.vector_store %arg6[%c0_10, %c0_11], %12 {strides = array<i32>} : memref<8x128xf32, #tpu.memory_space<vmem>>, vector<8x128xf32>,
    } else {
    }
    %c0 = arith.constant 0 : index
    %c0_1 = arith.constant 0 : index
    %3 = vector.load %arg6[%c0, %c0_1] : memref<8x128xf32, #tpu.memory_space<vmem>>, vector<8x128xf32>
    %c0_2 = arith.constant 0 : index
    %c0_3 = arith.constant 0 : index
    %4 = vector.load %arg1[%c0_2, %c0_3] : memref<8x128xf32, #tpu.memory_space<vmem>>, vector<8x128xf32>
    %c0_4 = arith.constant 0 : index
    %c0_5 = arith.constant 0 : index
    %5 = vector.load %arg2[%c0_4, %c0_5] : memref<128x128xf32, #tpu.memory_space<vmem>>, vector<128x128xf32>
    %cst = arith.constant dense<0.000000e+00> : vector<8x128xf32>
    %6 = tpu.matmul %4, %5, %cst {dimension_numbers = #tpu.dot_dimension_numbers<[1], [1], [0], [0], [0, 0, 1, 0], [], []>} : vector<8x128xf32>, vector<128x128xf32>, vector<8x128xf32> -> vector<8x128xf32>
    %7 = arith.addf %3, %6 : vector<8x128xf32>
    %c0_6 = arith.constant 0 : index
    %c0_7 = arith.constant 0 : index
    %8 = vector.load %arg6[%c0_6, %c0_7] : memref<8x128xf32, #tpu.memory_space<vmem>>, vector<8x128xf32>
    tpu.vector_store %arg6[%c0_6, %c0_7], %7 {strides = array<i32>} : memref<8x128xf32, #tpu.memory_space<vmem>>, vector<8x128xf32>,
    %c2_i32 = arith.constant 2 : i32
    %9 = arith.cmpi eq, %arg0, %c2_i32 : i32
    %10 = arith.extui %9 : i1 to i32
    %c0_i32_8 = arith.constant 0 : i32
    %11 = arith.cmpi ne, %10, %c0_i32_8 : i32
    scf.if %11 {
      %c0_9 = arith.constant 0 : index
      %c0_10 = arith.constant 0 : index
      %12 = vector.load %arg6[%c0_9, %c0_10] : memref<8x128xf32, #tpu.memory_space<vmem>>, vector<8x128xf32>
      %c0_11 = arith.constant 0 : index
      %c0_12 = arith.constant 0 : index
      %13 = vector.load %arg3[%c0_11, %c0_12] : memref<1x128xf32, #tpu.memory_space<vmem>>, vector<1x128xf32>
      %14 = vector.broadcast %13 : vector<1x128xf32> to vector<8x128xf32>
      %15 = arith.mulf %12, %14 : vector<8x128xf32>
      %16 = tpu.iota {dimensions = array<i32: 1>} : vector<8x128xi32>
      %c8_i32 = arith.constant 8 : i32
      %17 = vector.broadcast %c8_i32 : i32 to vector<8x128xi32>
      %18 = arith.cmpi slt, %16, %17 : vector<8x128xi32>
      %cst_13 = arith.constant -1.000000e+30 : f32
      %19 = vector.broadcast %cst_13 : f32 to vector<8x128xf32>
      %20 = arith.select %18, %15, %19 : vector<8x128xi1>, vector<8x128xf32>
      %cst_14 = arith.constant dense<0xFF800000> : vector<8xf32>
      %21 = vector.multi_reduction <maximumf>, %20, %cst_14 [1] : vector<8x128xf32> to vector<8xf32>
      %22 = vector.shape_cast %21 : vector<8xf32> to vector<8x1xf32>
      %23 = vector.broadcast %22 : vector<8x1xf32> to vector<8x128xf32>
      %24 = arith.subf %20, %23 : vector<8x128xf32>
      %25 = math.exp %24 : vector<8x128xf32>
      %cst_15 = arith.constant dense<0.000000e+00> : vector<8xf32>
      %26 = vector.multi_reduction <add>, %25, %cst_15 [1] : vector<8x128xf32> to vector<8xf32>
      %27 = vector.shape_cast %26 : vector<8xf32> to vector<8x1xf32>
      %28 = math.log %27 : vector<8x1xf32>
      %29 = arith.addf %28, %22 : vector<8x1xf32>
      %c0_16 = arith.constant 0 : index
      %c0_17 = arith.constant 0 : index
      %30 = vector.load %arg4[%c0_16, %c0_17] : memref<8x1xi32, #tpu.memory_space<vmem>>, vector<8x1xi32>
      %31 = vector.broadcast %30 : vector<8x1xi32> to vector<8x128xi32>
      %32 = arith.cmpi eq, %16, %31 : vector<8x128xi32>
      %cst_18 = arith.constant 0.000000e+00 : f32
      %33 = vector.broadcast %cst_18 : f32 to vector<8x128xf32>
      %34 = arith.select %32, %15, %33 : vector<8x128xi1>, vector<8x128xf32>
      %cst_19 = arith.constant dense<0.000000e+00> : vector<8xf32>
      %35 = vector.multi_reduction <add>, %34, %cst_19 [1] : vector<8x128xf32> to vector<8xf32>
      %36 = vector.shape_cast %35 : vector<8xf32> to vector<8x1xf32>
      %37 = arith.subf %29, %36 : vector<8x1xf32>
      %c0_20 = arith.constant 0 : index
      %c0_21 = arith.constant 0 : index
      %38 = vector.load %arg5[%c0_20, %c0_21] : memref<8x1xf32, #tpu.memory_space<vmem>>, vector<8x1xf32>
      tpu.vector_store %arg5[%c0_20, %c0_21], %37 {strides = array<i32>} : memref<8x1xf32, #tpu.memory_space<vmem>>, vector<8x1xf32>,
    } else {
    }
    return
  }
  func.func @transform_0(%arg0: i32) -> (i32, i32) {
    %c0_i32 = arith.constant 0 : i32
    %c0_i32_0 = arith.constant 0 : i32
    return %c0_i32, %arg0 : i32, i32
  }
  func.func @transform_1(%arg0: i32) -> (i32, i32) {
    %c0_i32 = arith.constant 0 : i32
    %c0_i32_0 = arith.constant 0 : i32
    return %c0_i32, %arg0 : i32, i32
  }
  func.func @transform_2(%arg0: i32) -> (i32, i32) {
    %c0_i32 = arith.constant 0 : i32
    %c0_i32_0 = arith.constant 0 : i32
    %c0_i32_1 = arith.constant 0 : i32
    return %c0_i32, %c0_i32_0 : i32, i32
  }
  func.func @transform_3(%arg0: i32) -> (i32, i32) {
    %c0_i32 = arith.constant 0 : i32
    %c0_i32_0 = arith.constant 0 : i32
    %c0_i32_1 = arith.constant 0 : i32
    return %c0_i32, %c0_i32_0 : i32, i32
  }
  func.func @transform_4(%arg0: i32) -> (i32, i32) {
    %c0_i32 = arith.constant 0 : i32
    %c0_i32_0 = arith.constant 0 : i32
    %c0_i32_1 = arith.constant 0 : i32
    return %c0_i32, %c0_i32_0 : i32, i32
  }
}

</mosaic_0001>

<bundles_post_ra>
// kernel: tpu_custom_call.1
= control target key start
LH: loop header
LB: loop body
LE: loop exit
PB: predicated region body
PF: predicated region fallthrough
CT: control target
= control target key end

     0   :  { %9 = vsyncpa [#allocation4], 0  ;;  %s901_s0 = inlined_call_operand.hbm [shape: f32[8,384], index: 0, kind: input, shape index: {}]   ;;  %s902_s1 = inlined_call_operand.hbm [shape: f32[128,384], index: 1, kind: input, shape index: {}]   ;;  %s903_s2 = inlined_call_operand.vmem [shape: f32[1,128], index: 2, kind: input, shape index: {}]   ;;  %s904_s3 = inlined_call_operand.vmem [shape: s32[8,1], index: 3, kind: input, shape index: {}]   ;;  %s905_s4 = inlined_call_operand.vmem [shape: f32[8,1], index: 4, kind: output, shape index: {}]  }
   0x1   :  { %11 = vsyncpa [#allocation4 + $0x1], 0 }
   0x2   :  { %12 = vsyncpa [#allocation6], 0 }
   0x3   :  { %14 = vsyncpa [#allocation6 + $0x1], 0  ;;  %s717_s15 = smov 0   ;;  %s719_s16 = smov 0  }
   0x4   :  { %s721_s17 = smov 0   ;;  %s723_s18 = smov 0  }
   0x5 LB: > { %s736_s19 = sadd.s32 4294967295, %s680_s18   ;;  %s739_s20 = sadd.s32 1, %s680_s18   ;;  %s680_s18 = sphi %s723_s18, %s914_s18   ;;  %s676_s17 = sphi %s721_s17, %s913_s17   ;;  %s672_s16 = sphi %s719_s16, %s912_s16   ;;  %s668_s15 = sphi %s717_s15, %s911_s15  }
   0x6   : > { %s24_s21 = ssub.s32 %s680_s18, %s739_s20  ;;  %s27_s22 = sadd.s32 1, %s676_s17 }
   0x7   : > { %p25_p0 = scmp.eq.s32.totalorder %s24_s21, 0  ;;  %p34_p1 = scmp.ne.s32.totalorder %s676_s17, %s672_s16 }
   0x8   : > { %p35_p2 = scmp.eq.s32.totalorder %s680_s18, 0  ;;  %p40_p3 = scmp.ne.s32.totalorder %s672_s16, %s668_s15 }
   0x9   : > { %s749_s23 = scalar_select %p25_p0, %s676_s17, %s27_s22  }
   0xa   : > { %p36_p4 = por %p35_p2, %p34_p1  ;;  %p41_p5 = scmp.eq.s32.totalorder %s736_s19, 0 }
   0xb   : > { %p536_p6 = scmp.lt.s32.totalorder %s680_s18, 3  ;;  %s758_s25 = sand.u32 1, %s676_s17  }
   0xc   : > { %p753_p7 = por %p41_p5, %p40_p3  ;;  %s437_s26 = sshll.u32 %s758_s25, 3 }
   0xd   : > { %s438_s27 = sshll.u32 %s680_s18, 7  ;;  %s163_s5 = scalar_lea.vmem [#allocation3], %s437_s26 }
   0xe   : > { %s907_s24 = scalar_select %p753_p7, 1, 0 }
   0xf   : > { %s767_s30 = scalar_lea.hbm %s901_s0, %s438_s27  ;;  %s170_s6 = sshll.u32 %s163_s5, 4  ;;  %s769_s6 = int_to_ptr.vmem [resolvable:$true] %s170_s6 }
  0x10   : > { %p771_p8 = pnand %p536_p6, %p36_p4  ;;  %s439_s8 = sshll.u32 %s758_s25, 7 }
  0x11   : > { %s160_s9 = scalar_lea.sflag [#allocation4], %s758_s25  ;;  %s582_s10 = scalar_lea.hbm %s767_s30, 128 }
  0x12   : > { %p583_p9 = scmp.ne.s32.totalorder %s767_s30, %s582_s10  ;;  %p584_p10 = pneg %p771_p8 }
  0x13   : > { %s587_s13 = scalar_lea.hbm %s901_s0, 384  ;;  %p588_p13 = scmp.lt.u32.totalorder %s767_s30, %s901_s0 }
  0x14   : > { %p585_p11 = pnand %p584_p10, %p583_p9  ;;  %p589_p0 = scmp.lt.u32.totalorder %s587_s13, %s582_s10 }
  0x15   : > { %p591_p2 = scmp.lt.u32.totalorder %s582_s10, %s767_s30 }
  0x16   : > { %p586_p12 = pneg %p585_p11  ;;  %p590_p1 = por %p589_p0, %p588_p13 }
  0x18   : > { %p592_p3 = por %p591_p2, %p590_p1 }
  0x1a   : > { %p593_p4 = pnand %p592_p3, %p586_p12 }
  0x1c   : > { %596 = shalt.err (!%p593_p4)
}
  0x1d   : > { %s597_s21 = scalar_lea.vmem %s769_s6, 128  ;;  %s682_s22 = smov [#allocation3]  }
  0x1e   : > { %p598_p5 = scmp.ne.s32.totalorder %s769_s6, %s597_s21  ;;  %s602_s26 = sshll.u32 %s682_s22, 4  ;;  %s603_s26 = int_to_ptr.vmem [resolvable:$false] %s602_s26 }
  0x1f   : > { %s604_s28 = scalar_lea.vmem %s603_s26, 256  ;;  %p605_p11 = scmp.lt.s32.totalorder %s769_s6, %s603_s26 }
  0x20   : > { %p600_p6 = pnand %p598_p5, %p584_p10  ;;  %p606_p13 = scmp.lt.s32.totalorder %s604_s28, %s597_s21 }
  0x22   : > { %p601_p9 = pneg %p600_p6  ;;  %p607_p0 = por %p606_p13, %p605_p11 }
  0x24   : > { %p608_p1 = pnand %p607_p0, %p601_p9 }
  0x26   : > { %611 = shalt.err (!%p608_p1)
}
  0x27   : > { %532 = dma.hbm_to_vmem [thread:$0]  (!%p771_p8), %s767_s30, 128, %s769_s6, %s160_s9  }
  0x28   : > { %s807_s10 = scalar_lea.hbm %s902_s1, %s438_s27  ;;  %p441_p12 = scmp.ge.s32.totalorder %s680_s18, 1 }
  0x29   : > { %p195_p2 = scmp.lt.s32.totalorder %s680_s18, 4  ;;  %s181_s11 = scalar_lea.vmem [#allocation5], %s439_s8 }
  0x2a   : > { %s187_s12 = sshll.u32 %s181_s11, 4  ;;  %s178_s30 = scalar_lea.sflag [#allocation6], %s758_s25  ;;  %s813_s12 = int_to_ptr.vmem [resolvable:$true] %s187_s12 }
  0x2b   : > { %p815_p3 = pnand %p441_p12, %p195_p2  ;;  %s612_s6 = scalar_lea.hbm %s807_s10, 2048 }
  0x2c   : > { %p613_p4 = scmp.ne.s32.totalorder %s807_s10, %s612_s6  ;;  %s617_s18 = scalar_lea.hbm %s902_s1, 6144 }
  0x2d   : > { %p618_p9 = scmp.lt.u32.totalorder %s807_s10, %s902_s1  ;;  %p619_p11 = scmp.lt.u32.totalorder %s617_s18, %s612_s6 }
  0x2e   : > { %p615_p5 = pnand %p613_p4, %p584_p10  ;;  %p621_p0 = scmp.lt.u32.totalorder %s612_s6, %s807_s10 }
  0x2f   : > { %p620_p13 = por %p619_p11, %p618_p9 }
  0x30   : > { %p616_p6 = pneg %p615_p5 }
  0x31   : > { %p622_p1 = por %p621_p0, %p620_p13 }
  0x33   : > { %p623_p12 = pnand %p622_p1, %p616_p6 }
  0x35   : > { %626 = shalt.err (!%p623_p12)
}
  0x36   : > { %s627_s15 = scalar_lea.vmem %s813_s12, 2048  ;;  %s683_s21 = smov [#allocation5]  }
  0x37   : > { %p628_p2 = scmp.ne.s32.totalorder %s813_s12, %s627_s15  ;;  %s632_s22 = sshll.u32 %s683_s21, 4  ;;  %s633_s22 = int_to_ptr.vmem [resolvable:$false] %s632_s22 }
  0x38   : > { %s634_s26 = scalar_lea.vmem %s633_s22, 4096  ;;  %p635_p7 = scmp.lt.s32.totalorder %s813_s12, %s633_s22 }
  0x39   : > { %p630_p4 = pnand %p628_p2, %p584_p10  ;;  %p636_p9 = scmp.lt.s32.totalorder %s634_s26, %s627_s15 }
  0x3b   : > { %p631_p5 = pneg %p630_p4  ;;  %p637_p11 = por %p636_p9, %p635_p7 }
  0x3d   : > { %p638_p13 = pnand %p637_p11, %p631_p5 }
  0x3f   : > { %641 = shalt.err (!%p638_p13)
}
  0x40   : > { %s684_s28 = smov 384   ;;  %s685_s29 = smov 128  }
  0x41   : > { %s686_s5 = smov 8   ;;  %199 = sbr.rel (%p815_p3) target bundleno = 693 (0x2b5), region = 36 }
  0x42   : > { %535 = dma.hbm_to_vmem [thread:$0]  (!%p771_p8), %s807_s10, 2048, %s813_s12, %s178_s30, %s684_s28, %s685_s29, %s686_s5  }
  0x43   : > { %s201_s11 = sand.u32 (!%p815_p3), 1, %s672_s16   ;;  %p910_p7 = scmp.ne.s32.totalorder (!%p815_p3), %s907_s24, 0 }
  0x44   : > { %s442_s6 = sshll.u32 (!%p815_p3), %s201_s11, 3  ;;  %s202_s27 = scalar_lea.sflag (!%p815_p3), [#allocation4], %s201_s11 }
  0x45   : > { %s848_s9 = scalar_lea.vmem (!%p815_p3), [#allocation3], %s442_s6 }
  0x48   : > { %659 = dma.done.wait (%p910_p7), %s202_s27, 128  }
  0x49   : > { %661 = vsyncadd (%p910_p7), %s202_s27, 4294967168  ;;  %s443_s18 = sshll.u32 %s201_s11, 7  ;;  %s211_s7 = scalar_lea.sflag [#allocation6], %s201_s11 }
  0x4a   : > { %s854_s25 = scalar_lea.vmem [#allocation5], %s443_s18 }
  0x4b   : > { %663 = dma.done.wait (%p910_p7), %s211_s7, 2048  }
  0x4c   : > { %665 = vsyncadd (%p910_p7), %s211_s7, 4294965248  ;;  %p444_p8 = scmp.ne.s32.totalorder %s736_s19, 0 }
  0x4d   : > { %v687_v0 = vmov (!%p444_p8), 0.0  }
  0x4e   : > { %242 = sbr.rel (%p444_p8) target bundleno = 85 (0x55), region = 48  ;;  %243 = vst [vmem:[#allocation2] sm:$0xff] (!%p444_p8), %v687_v0 }
  0x55 PF: > { %v246_v1 = vld [vmem:[%s854_s25] sm:$0xff]  ;;  %v247_v2 = vld [vmem:[%s854_s25 + $0x8] sm:$0xff]  ;;  %v688_v3 = vmov 0.0|0.0   ;;  %vm689_vm0 = vmmov 0   ;;  %v690_v5 = vmov 0.0   ;;  %v248_v6 = vld [vmem:[%s854_s25 + $0x10] sm:$0xff] }
  0x56   : > { %501 = vmatprep.subr.bf16.mxu0 %v688_v3  ;;  %v502_v4 = vpack.c.bf16 %v247_v2, %v246_v1  ;;  %498 = vmatprep.mubr.msk.f32.mxu0 %vm689_vm0, %v690_v5  ;;  %v249_v7 = vld [vmem:[%s854_s25 + $0x18] sm:$0xff]  ;;  %v250_v9 = vld [vmem:[%s854_s25 + $0x20] sm:$0xff]  ;;  %v251_v10 = vld [vmem:[%s854_s25 + $0x28] sm:$0xff]  ;;  %p445_p10 = scmp.ne.s32.totalorder %s736_s19, 2 }
  0x57   : > { %v505_v8 = vpack.c.bf16 %v249_v7, %v248_v6  ;;  %v508_v11 = vpack.c.bf16 %v251_v10, %v250_v9  ;;  %v252_v12 = vld [vmem:[%s854_s25 + $0x30] sm:$0xff]  ;;  %v253_v13 = vld [vmem:[%s854_s25 + $0x38] sm:$0xff]  ;;  %v254_v15 = vld [vmem:[%s854_s25 + $0x40] sm:$0xff]  ;;  %v347_v34 = vlaneseq (!%p445_p10)  ;;  %v691_v36 = vmov (!%p445_p10), 0  }
  0x58   : > { %503 = vmatpush3.bf16.xpose.msra.mxu0 %v502_v4  ;;  %v511_v14 = vpack.c.bf16 %v253_v13, %v252_v12  ;;  %v255_v16 = vld [vmem:[%s854_s25 + $0x48] sm:$0xff]  ;;  %v256_v18 = vld [vmem:[%s854_s25 + $0x50] sm:$0xff]  ;;  %v257_v19 = vld [vmem:[%s854_s25 + $0x58] sm:$0xff]  ;;  %577 = vset.pattern.permute.xlu0 (!%p445_p10), %v691_v36  ;;  %vm370_vm3 = vcmask (!%p445_p10), 7168  }
  0x59   : > { %504 = vmatprep.subr.bf16.mxu0 %v688_v3  ;;  %v514_v17 = vpack.c.bf16 %v255_v16, %v254_v15  ;;  %v517_v20 = vpack.c.bf16 %v257_v19, %v256_v18  ;;  %v258_v21 = vld [vmem:[%s854_s25 + $0x60] sm:$0xff]  ;;  %v259_v22 = vld [vmem:[%s854_s25 + $0x68] sm:$0xff]  ;;  %v260_v24 = vld [vmem:[%s854_s25 + $0x70] sm:$0xff]  ;;  %v348_v37 = vand.u32 (!%p445_p10), 127, %v347_v34 }
  0x5a   : > { %v520_v23 = vpack.c.bf16 %v259_v22, %v258_v21  ;;  %v261_v25 = vld [vmem:[%s854_s25 + $0x78] sm:$0xff]  ;;  %v244_v28 = vld [vmem:[#allocation2] sm:$0xff] }
  0x5b   : > { %v523_v26 = vpack.c.bf16 %v261_v25, %v260_v24  ;;  %v245_v27 = vld [vmem:[%s848_s9] sm:$0xff]  ;;  %v446_v33 = vld [vmem:[%s903_s2] ss:$0 sm:$0xff] (!%p445_p10)  ;;  %vm349_vm1 = vcmp.lt.s32.totalorder (!%p445_p10), %v348_v37, 8 }
  0x5c   : > { %v361_v39 = vld [vmem:[%s904_s3] sm:$0xff] (!%p445_p10) }
  0x60   : > { %506 = vmatpush3.bf16.xpose.msra.mxu0 %v505_v8 }
  0x61   : > { %507 = vmatprep.subr.bf16.mxu0 %v688_v3 }
  0x68   : > { %509 = vmatpush3.bf16.xpose.msra.mxu0 %v508_v11 }
  0x69   : > { %510 = vmatprep.subr.bf16.mxu0 %v688_v3 }
  0x70   : > { %512 = vmatpush3.bf16.xpose.msra.mxu0 %v511_v14 }
  0x71   : > { %513 = vmatprep.subr.bf16.mxu0 %v688_v3 }
  0x78   : > { %515 = vmatpush3.bf16.xpose.msra.mxu0 %v514_v17 }
  0x79   : > { %516 = vmatprep.subr.bf16.mxu0 %v688_v3 }
  0x80   : > { %518 = vmatpush3.bf16.xpose.msra.mxu0 %v517_v20 }
  0x81   : > { %519 = vmatprep.subr.bf16.mxu0 %v688_v3 }
  0x88   : > { %521 = vmatpush3.bf16.xpose.msra.mxu0 %v520_v23 }
  0x89   : > { %522 = vmatprep.subr.bf16.mxu0 %v688_v3 }
  0x90   : > { %524 = vmatpush3.bf16.xpose.msra.mxu0 %v523_v26 }
  0x97   : > { %499 = vmatmul.mubr.f32.vlgmr.msra.gmra.mrb[0].mxu0 %v245_v27 }
 0x167   : > { %337 = sbr.rel (%p445_p10) target bundleno = 693 (0x2b5), region = 52 }
 0x16a   : > { %v328_v29 = vpop.f32.mrb[0].mxu0 }
 0x16b   : > { %v332_v30 = vadd.f32 %v328_v29, %v244_v28  ;;  %v500_v31 = vpop.f32.mrb[1].mxu0 }
 0x16d   : > { %333 = vst [vmem:[#allocation2] sm:$0xff] %v332_v30 }
 0x174   : > { %v338_v32 = vld [vmem:[#allocation2] sm:$0xff] }
 0x175   : > { %v346_v35 = vmul.f32 %v446_v33, %v338_v32 }
 0x177   : > { %v350_v38 = vsel %vm349_vm1, %v346_v35, -1e+30 }
 0x178   : > { %351 = vmax.xlane.f32.xlu0 %v350_v38 }
 0x18e   : > { %363 = vperm.xlu0 %577, %v361_v39  }
 0x205   : > { %v352_v40 = vpop.xlane.xlu0 %351 }
 0x206   : > { %v353_v41 = vsub.f32 %v350_v38, %v352_v40 }
 0x208   : > { %v354_v42 = vmul.f32 1.442695, %v353_v41 }
 0x20a   : > { %578 = vpow2.f32 %v354_v42 }
 0x20d   : > { %v364_v43 = vpop.permute.xlu0 %363 }
 0x20e   : > { %vm365_vm2 = vcmp.eq.s32.totalorder %v348_v37, %v364_v43 }
 0x20f   : > { %v366_v45 = vsel %vm365_vm2, %v346_v35, 0.0 }
 0x214   : > { %v579_v44 = vpop.eup %578 }
 0x215   : > { %356 = vadd.xlane.f32.xlu1 %v579_v44 }
 0x219   : > { %367 = vadd.xlane.f32.xlu1 %v366_v45 }
 0x2a2   : > { %v357_v46 = vpop.xlane.xlu1 %356 }
 0x2a3   : > { %580 = vlog2.f32 %v357_v46 }
 0x2a6   : > { %v368_v49 = vpop.xlane.xlu1 %367 }
 0x2ad   : > { %v581_v47 = vpop.eup %580 }
 0x2ae   : > { %v359_v48 = vmul.f32 0.6931472, %v581_v47 }
 0x2b0   : > { %v360_v50 = vadd.f32 %v359_v48, %v352_v40 }
 0x2b2   : > { %v369_v51 = vsub.f32 %v360_v50, %v368_v49 }
 0x2b4   : > { %371 = vst.msk [vmem:[%s905_s4] sm:$0xff] %vm370_vm3, %v369_v51 }
 0x2b5 PF: > { %p17_p3 = scmp.ge.s32.totalorder %s739_s20, 5   ;;  %s911_s15 = smov %s672_s16 }
 0x2b6   : > { %s912_s16 = smov %s676_s17  ;;  %s913_s17 = smov %s749_s23 }
 0x2b7   : > { %s914_s18 = smov %s739_s20  ;;  %19 = sbr.rel (!%p17_p3) target bundleno = 5 (0x5), region = 93 }
 0x2be   :  { %383 = vsyncpa [#allocation4], 1 }
 0x2bf   :  { %385 = vsyncpa [#allocation4 + $0x1], 1 }
 0x2c0   :  { %386 = vsyncpa [#allocation6], 1 }
 0x2c1   :  { %388 = vsyncpa [#allocation6 + $0x1], 1 }

</bundles_post_ra>
